<compile_context>
chip_gen: v7x
topology: tpu7x:2x2x1
jax: 0.10.0
libtpu: 0.0.40
codegen_flags: <defaults>
</compile_context>

<pallas_src>
import jax
import jax.numpy as jnp
import numpy as np
from jax.experimental import pallas as pl
from jax.experimental.pallas import tpu as pltpu

LANE = 128
_VMEM_LIMIT = 64 * 1024 * 1024  # re-derived for v7x's 64 MiB VMEM; fine on v5e/v6e


def _round_up(x, m):
    return (x + m - 1) // m * m


def _pick_row_tile(n, target):
    """Largest multiple-of-8 divisor of n that is <= target (else n itself)."""
    if n <= target:
        return n
    t = (target // 8) * 8
    while t >= 8:
        if n % t == 0:
            return t
        t -= 8
    return n


def _pad2(w, rows, cols):
    return jnp.pad(w, ((0, rows - w.shape[0]), (0, cols - w.shape[1])))


# ---------------------------------------------------------------------------
# Kernel 1: Y_proj[t] = relu( A[t] @ (X[t] @ W) ) @ W_cat + b_cat
# ---------------------------------------------------------------------------
def _gcn_proj_kernel(a_ref, x_ref, w_ref, wcat_ref, bcat_ref, yproj_ref, xw_sc):
    # XW depends only on t: compute once per t (row tile 0), reuse for the
    # remaining row tiles of the same t (row axis is innermost / "arbitrary").
    @pl.when(pl.program_id(1) == 0)
    def _():
        xw_sc[...] = jnp.dot(
            x_ref[0], w_ref[...],
            preferred_element_type=jnp.float32).astype(xw_sc.dtype)

    ax = jnp.dot(a_ref[0], xw_sc[...], preferred_element_type=jnp.float32)
    y = jnp.maximum(ax, 0.0)                                   # relu (f32)
    yproj_ref[0] = (
        jnp.dot(y.astype(wcat_ref.dtype), wcat_ref[...],
                preferred_element_type=jnp.float32)
        + bcat_ref[...]
    ).astype(yproj_ref.dtype)


def gcn_input_proj(A, X, W, W_cat, b_cat, *, out_dtype, tile_m=256):
    T, N, _ = A.shape
    Fin = X.shape[-1]
    Hp = W.shape[-1]
    H4 = W_cat.shape[-1]
    tm = _pick_row_tile(N, tile_m)
    return pl.pallas_call(
        _gcn_proj_kernel,
        out_shape=jax.ShapeDtypeStruct((T, N, H4), out_dtype),
        grid_spec=pltpu.PrefetchScalarGridSpec(
            num_scalar_prefetch=0,
            grid=(T, N // tm),
            in_specs=[
                pl.BlockSpec((1, tm, N), lambda t, n: (t, n, 0)),    # A row tile
                pl.BlockSpec((1, N, Fin), lambda t, n: (t, 0, 0)),   # X[t]
                pl.BlockSpec((Fin, Hp), lambda t, n: (0, 0)),        # W
                pl.BlockSpec((Hp, H4), lambda t, n: (0, 0)),         # W_cat
                pl.BlockSpec((1, H4), lambda t, n: (0, 0)),          # b_cat (f32)
            ],
            out_specs=pl.BlockSpec((1, tm, H4), lambda t, n: (t, n, 0)),
            scratch_shapes=[pltpu.VMEM((N, Hp), A.dtype)],           # XW
        ),
        compiler_params=pltpu.CompilerParams(
            dimension_semantics=("parallel", "arbitrary"),
            vmem_limit_bytes=_VMEM_LIMIT),
    )(A, X, W, W_cat, b_cat)


# ---------------------------------------------------------------------------
# Kernel 2: LSTM recurrence.  Grid = (node tiles ["parallel"], T ["arbitrary"]);
# h/c are carried across T in f32 VMEM scratch; Y_proj / Z stream per step.
# Gate order in the packed 4Hp axis: [f | j | c | o].
# NOTE: the candidate cell `ct` uses sigmoid (not tanh) to exactly match the
# reference PyTorch implementation -- do not "fix" this.
# ---------------------------------------------------------------------------
def _lstm_kernel(yproj_ref, ucat_ref, h0_ref, c0_ref, z_ref, h_sc, c_sc):
    Hp = h_sc.shape[-1]
    t = pl.program_id(1)

    @pl.when(t == 0)
    def _():
        h_sc[...] = jnp.broadcast_to(h0_ref[...].astype(jnp.float32), h_sc.shape)
        c_sc[...] = jnp.broadcast_to(c0_ref[...].astype(jnp.float32), c_sc.shape)

    h = h_sc[...]
    # One packed recurrent matmul; the input projection + bias were fused in
    # kernel 1.  Gate nonlinearities stay f32 (EUP budget note: no extra
    # transcendentals added; bf16 nonlinearities are a further v6e/v7x option).
    gates = jax.nn.sigmoid(
        yproj_ref[0].astype(jnp.float32)
        + jnp.dot(h.astype(ucat_ref.dtype), ucat_ref[...],
                  preferred_element_type=jnp.float32))
    f = gates[:, 0 * Hp:1 * Hp]
    j = gates[:, 1 * Hp:2 * Hp]
    ct = gates[:, 2 * Hp:3 * Hp]        # sigmoid candidate, per reference
    o = gates[:, 3 * Hp:4 * Hp]
    c_new = j * ct + f * c_sc[...]
    h_new = o * jnp.tanh(c_new)
    c_sc[...] = c_new
    h_sc[...] = h_new
    z_ref[0] = h_new.astype(z_ref.dtype)


def lstm(Y_proj, U_cat, h0, c0, *, out_dtype, tile_m=256):
    T, N, H4 = Y_proj.shape
    Hp = H4 // 4
    tm = _pick_row_tile(N, tile_m)
    return pl.pallas_call(
        _lstm_kernel,
        out_shape=jax.ShapeDtypeStruct((T, N, Hp), out_dtype),
        grid_spec=pltpu.PrefetchScalarGridSpec(
            num_scalar_prefetch=0,
            grid=(N // tm, T),
            in_specs=[
                pl.BlockSpec((1, tm, H4), lambda n, t: (t, n, 0)),   # Y_proj[t]
                pl.BlockSpec((Hp, H4), lambda n, t: (0, 0)),         # U_cat
                pl.BlockSpec((1, Hp), lambda n, t: (0, 0)),          # h_init
                pl.BlockSpec((1, Hp), lambda n, t: (0, 0)),          # c_init
            ],
            out_specs=pl.BlockSpec((1, tm, Hp), lambda n, t: (t, n, 0)),
            scratch_shapes=[pltpu.VMEM((tm, Hp), jnp.float32),       # h
                            pltpu.VMEM((tm, Hp), jnp.float32)],      # c
        ),
        compiler_params=pltpu.CompilerParams(
            dimension_semantics=("parallel", "arbitrary"),
            vmem_limit_bytes=_VMEM_LIMIT),
    )(Y_proj, U_cat, h0, c0)


# ---------------------------------------------------------------------------
# Kernel 3: fused edge gather + readout.
#   out[e] = Z[src[e]] @ U_src + Z[trg[e]] @ U_trg
# Indices are scalar-prefetched; Z rows are DMA-gathered directly from HBM.
# ---------------------------------------------------------------------------
def edge_readout(Z_flat, edge_src, edge_trg, U_src, U_trg, *,
                 out_dtype=jnp.float32, tile_e=1024):
    _, Hp = Z_flat.shape
    H2p = U_src.shape[-1]
    E = edge_src.shape[0]
    tile_e = min(tile_e, _round_up(E, 8))
    E_pad = _round_up(E, tile_e)
    if E_pad != E:
        pad = E_pad - E
        edge_src = jnp.pad(edge_src, (0, pad))   # pads with 0 -> valid row
        edge_trg = jnp.pad(edge_trg, (0, pad))

    def kernel(src_ref, trg_ref, z_hbm, us_ref, ut_ref, out_ref,
               zs_buf, zt_buf, sem):
        e0 = pl.program_id(0) * tile_e

        # TODO(synk): for large tile_e, batch these row DMAs (issue-all /
        # wait-all with a semaphore array) instead of serial issue+wait.
        @pl.loop(0, tile_e)
        def _(r):
            cs = pltpu.make_async_copy(z_hbm.at[src_ref[e0 + r]],
                                       zs_buf.at[r], sem.at[0])
            ct = pltpu.make_async_copy(z_hbm.at[trg_ref[e0 + r]],
                                       zt_buf.at[r], sem.at[1])
            cs.start()
            ct.start()
            cs.wait()
            ct.wait()

        out_ref[...] = (
            jnp.dot(zs_buf[...], us_ref[...], preferred_element_type=jnp.float32)
            + jnp.dot(zt_buf[...], ut_ref[...], preferred_element_type=jnp.float32)
        ).astype(out_ref.dtype)

    out = pl.pallas_call(
        kernel,
        out_shape=jax.ShapeDtypeStruct((E_pad, H2p), out_dtype),
        grid_spec=pltpu.PrefetchScalarGridSpec(
            num_scalar_prefetch=2,
            grid=(E_pad // tile_e,),
            in_specs=[
                pl.BlockSpec(memory_space=pl.ANY),                  # Z stays in HBM
                pl.BlockSpec((Hp, H2p), lambda e, s, t: (0, 0)),    # U_src
                pl.BlockSpec((Hp, H2p), lambda e, s, t: (0, 0)),    # U_trg
            ],
            out_specs=pl.BlockSpec((tile_e, H2p), lambda e, s, t: (e, 0)),
            scratch_shapes=[
                pltpu.VMEM((tile_e, Hp), Z_flat.dtype),
                pltpu.VMEM((tile_e, Hp), Z_flat.dtype),
                pltpu.SemaphoreType.DMA((2,)),
            ],
        ),
        compiler_params=pltpu.CompilerParams(
            dimension_semantics=("parallel",),
            vmem_limit_bytes=_VMEM_LIMIT),
    )(edge_src, edge_trg, Z_flat, U_src, U_trg)
    return out[:E]


# ---------------------------------------------------------------------------
# Full forward pass (glue in plain JAX)
# ---------------------------------------------------------------------------
def wd_gcn_forward(A, X, edges, params, *, use_bf16=False):
    T, N, Fin = X.shape
    H = params["W"].shape[-1]
    H1 = params["U"].shape[-1]
    Hp = _round_up(H, LANE)      # lane-dense hidden width (zero padded)
    H2p = _round_up(H1, LANE)    # lane-dense readout width (zero padded)
    cdt = jnp.bfloat16 if use_bf16 else jnp.float32

    # Zero padding is exact: padded W columns make the padded Y columns zero,
    # zero pad-rows of U_cat keep padded h columns out of the real gates, and
    # zero pad-rows/cols of U are sliced off the final output.
    W = _pad2(params["W"], Fin, Hp)
    W_cat = jnp.concatenate(
        [_pad2(params[k], Hp, Hp) for k in ("Wf", "Wj", "Wc", "Wo")], axis=1)
    U_cat = jnp.concatenate(
        [_pad2(params[k], Hp, Hp) for k in ("Uf", "Uj", "Uc", "Uo")], axis=1)
    b_cat = jnp.concatenate(
        [jnp.pad(params[k], (0, Hp - H)) for k in ("bf", "bj", "bc", "bo")]
    ).reshape(1, 4 * Hp).astype(jnp.float32)
    h0 = jnp.pad(params["h_init"], (0, Hp - H)).reshape(1, Hp).astype(jnp.float32)
    c0 = jnp.pad(params["c_init"], (0, Hp - H)).reshape(1, Hp).astype(jnp.float32)
    U_src = _pad2(params["U"][:H], Hp, H2p)
    U_trg = _pad2(params["U"][H:], Hp, H2p)

    # Kernel 1: GCN layer + hoisted LSTM input projection, time-parallel.
    Y_proj = gcn_input_proj(A.astype(cdt), X.astype(cdt), W.astype(cdt),
                            W_cat.astype(cdt), b_cat, out_dtype=cdt)  # (T,N,4Hp)

    # Kernel 2: sequential LSTM recurrence (node-parallel, time-streamed).
    Z = lstm(Y_proj, U_cat.astype(cdt), h0, c0, out_dtype=cdt)        # (T,N,Hp)

    # Kernel 3: fused gather + split-U readout (no concat, no XLA gather).
    edge_src_nodes = (edges[0] * N + edges[1]).astype(jnp.int32)
    edge_trg_nodes = (edges[0] * N + edges[2]).astype(jnp.int32)
    Z_flat = Z.reshape(T * N, Hp)
    out = edge_readout(Z_flat, edge_src_nodes, edge_trg_nodes,
                       U_src.astype(cdt), U_trg.astype(cdt),
                       out_dtype=jnp.float32)                          # (E,H2p)
    return out[:, :H1]   # strip readout lane padding


# ---------------------------------------------------------------------------
# Pure-JAX reference (mirrors the PyTorch module exactly)
# ---------------------------------------------------------------------------
def wd_gcn_reference(A, X, edges, params):
    T, N, _ = X.shape
    AX = jnp.einsum("tnm,tmf->tnf", A, X)
    Y = jax.nn.relu(AX @ params["W"])
    H = params["W"].shape[-1]

    h = jnp.broadcast_to(params["h_init"], (N, H))
    c = jnp.broadcast_to(params["c_init"], (N, H))
    Zs = []
    for ti in range(T):
        y = Y[ti]
        f = jax.nn.sigmoid(y @ params["Wf"] + h @ params["Uf"] + params["bf"])
        j = jax.nn.sigmoid(y @ params["Wj"] + h @ params["Uj"] + params["bj"])
        o = jax.nn.sigmoid(y @ params["Wo"] + h @ params["Uo"] + params["bo"])
        ct = jax.nn.sigmoid(y @ params["Wc"] + h @ params["Uc"] + params["bc"])
        c = j * ct + f * c
        h = o * jnp.tanh(c)
        Zs.append(h)
    Z = jnp.stack(Zs, axis=0)

    src = edges[0] * N + edges[1]
    trg = edges[0] * N + edges[2]
    Z_flat = Z.reshape(-1, H)
    Z_mat = jnp.concatenate([Z_flat[src], Z_flat[trg]], axis=1)
    return Z_mat @ params["U"]


if __name__ == "__main__":
    T, N, Fin = 8, 16, 8
    hidden_feat = [4, 4]
    E = 32

    key = jax.random.PRNGKey(0)
    keys = jax.random.split(key, 20)

    A = jax.random.normal(keys[0], (T, N, N), dtype=jnp.float32) * 0.1
    X = jax.random.normal(keys[1], (T, N, Fin), dtype=jnp.float32)

    edges_time = jax.random.randint(keys[2], (E,), 0, T)
    edges_src = jax.random.randint(keys[3], (E,), 0, N)
    edges_trg = jax.random.randint(keys[4], (E,), 0, N)
    edges = jnp.stack([edges_time, edges_src, edges_trg], axis=0).astype(jnp.int32)

    H0, H1 = hidden_feat
    params = {
        "W":  jax.random.normal(keys[5],  (Fin, H0), dtype=jnp.float32),
        "Wf": jax.random.normal(keys[6],  (H0, H0), dtype=jnp.float32),
        "Wj": jax.random.normal(keys[7],  (H0, H0), dtype=jnp.float32),
        "Wc": jax.random.normal(keys[8],  (H0, H0), dtype=jnp.float32),
        "Wo": jax.random.normal(keys[9],  (H0, H0), dtype=jnp.float32),
        "Uf": jax.random.normal(keys[10], (H0, H0), dtype=jnp.float32),
        "Uj": jax.random.normal(keys[11], (H0, H0), dtype=jnp.float32),
        "Uc": jax.random.normal(keys[12], (H0, H0), dtype=jnp.float32),
        "Uo": jax.random.normal(keys[13], (H0, H0), dtype=jnp.float32),
        "bf": jax.random.normal(keys[14], (H0,), dtype=jnp.float32),
        "bj": jax.random.normal(keys[15], (H0,), dtype=jnp.float32),
        "bc": jax.random.normal(keys[16], (H0,), dtype=jnp.float32),
        "bo": jax.random.normal(keys[17], (H0,), dtype=jnp.float32),
        "h_init": jax.random.normal(keys[18], (H0,), dtype=jnp.float32),
        "c_init": jax.random.normal(keys[19], (H0,), dtype=jnp.float32),
        "U": jax.random.normal(jax.random.PRNGKey(123), (2 * H0, H1),
                               dtype=jnp.float32),
    }

    # f32 path: must match the reference tightly.
    out = jax.block_until_ready(wd_gcn_forward(A, X, edges, params))
    ref = jax.block_until_ready(wd_gcn_reference(A, X, edges, params))
    np.testing.assert_allclose(np.asarray(out), np.asarray(ref),
                               rtol=1e-4, atol=1e-4)

    # bf16 production path (bf16 MXU operands, f32 accumulators/state):
    # exercised for compile/run sanity only, with a loose bound.
    out_bf16 = jax.block_until_ready(
        wd_gcn_forward(A, X, edges, params, use_bf16=True))
    out_bf16 = np.asarray(out_bf16, dtype=np.float32)
    assert np.all(np.isfinite(out_bf16))
    assert float(np.max(np.abs(out_bf16 - np.asarray(ref)))) < 1.0

    print("KERNEL_OK")
</pallas_src>

<mosaic_0001>
module attributes {stable_mosaic.version = 11 : i64} {
  func.func @_gcn_proj_kernel(%arg0: i32, %arg1: i32, %arg2: memref<1x16x16xf32, #tpu.memory_space<vmem>>, %arg3: memref<1x16x8xf32, #tpu.memory_space<vmem>>, %arg4: memref<8x128xf32, #tpu.memory_space<vmem>>, %arg5: memref<128x512xf32, #tpu.memory_space<vmem>>, %arg6: memref<1x512xf32, #tpu.memory_space<vmem>>, %arg7: memref<1x16x512xf32, #tpu.memory_space<vmem>>, %arg8: memref<16x128xf32, #tpu.memory_space<vmem>>) attributes {dimension_semantics = [#tpu.dimension_semantics<parallel>, #tpu.dimension_semantics<arbitrary>], iteration_bounds = array<i64: 8, 1>, scalar_prefetch = 0 : i64, scratch_operands = 1 : i64, tpu.core_type = #tpu.core_type<tc>, window_params = [{transform_indices = @transform_0, window_bounds = array<i64: 1, 16, 16>}, {transform_indices = @transform_1, window_bounds = array<i64: 1, 16, 8>}, {pipeline_mode = #tpu.pipeline_mode<synchronous>, transform_indices = @transform_2, window_bounds = array<i64: 8, 128>}, {pipeline_mode = #tpu.pipeline_mode<synchronous>, transform_indices = @transform_3, window_bounds = array<i64: 128, 512>}, {pipeline_mode = #tpu.pipeline_mode<synchronous>, transform_indices = @transform_4, window_bounds = array<i64: 1, 512>}, {transform_indices = @transform_5, window_bounds = array<i64: 1, 16, 512>}]} {
    %c0_i32 = arith.constant 0 : i32
    %0 = arith.cmpi eq, %arg1, %c0_i32 : i32
    %1 = arith.extui %0 : i1 to i32
    %c0_i32_0 = arith.constant 0 : i32
    %2 = arith.cmpi ne, %1, %c0_i32_0 : i32
    scf.if %2 {
      %c0_14 = arith.constant 0 : index
      %c0_15 = arith.constant 0 : index
      %c0_16 = arith.constant 0 : index
      %17 = vector.load %arg3[%c0_14, %c0_15, %c0_16] : memref<1x16x8xf32, #tpu.memory_space<vmem>>, vector<1x16x8xf32>
      %18 = vector.shape_cast %17 : vector<1x16x8xf32> to vector<16x8xf32>
      %c0_17 = arith.constant 0 : index
      %c0_18 = arith.constant 0 : index
      %19 = vector.load %arg4[%c0_17, %c0_18] : memref<8x128xf32, #tpu.memory_space<vmem>>, vector<8x128xf32>
      %cst_19 = arith.constant dense<0.000000e+00> : vector<16x128xf32>
      %20 = tpu.matmul %18, %19, %cst_19 {dimension_numbers = #tpu.dot_dimension_numbers<[1], [0], [0], [1], [0, 0, 1, 1], [], []>} : vector<16x8xf32>, vector<8x128xf32>, vector<16x128xf32> -> vector<16x128xf32>
      %c0_20 = arith.constant 0 : index
      %c0_21 = arith.constant 0 : index
      %21 = vector.load %arg8[%c0_20, %c0_21] : memref<16x128xf32, #tpu.memory_space<vmem>>, vector<16x128xf32>
      tpu.vector_store %arg8[%c0_20, %c0_21], %20 {strides = array<i32>} : memref<16x128xf32, #tpu.memory_space<vmem>>, vector<16x128xf32>,
    } else {
    }
    %c0 = arith.constant 0 : index
    %c0_1 = arith.constant 0 : index
    %c0_2 = arith.constant 0 : index
    %3 = vector.load %arg2[%c0, %c0_1, %c0_2] : memref<1x16x16xf32, #tpu.memory_space<vmem>>, vector<1x16x16xf32>
    %4 = vector.shape_cast %3 : vector<1x16x16xf32> to vector<16x16xf32>
    %c0_3 = arith.constant 0 : index
    %c0_4 = arith.constant 0 : index
    %5 = vector.load %arg8[%c0_3, %c0_4] : memref<16x128xf32, #tpu.memory_space<vmem>>, vector<16x128xf32>
    %cst = arith.constant dense<0.000000e+00> : vector<16x128xf32>
    %6 = tpu.matmul %4, %5, %cst {dimension_numbers = #tpu.dot_dimension_numbers<[1], [0], [0], [1], [0, 0, 1, 1], [], []>} : vector<16x16xf32>, vector<16x128xf32>, vector<16x128xf32> -> vector<16x128xf32>
    %cst_5 = arith.constant 0.000000e+00 : f32
    %7 = vector.broadcast %cst_5 : f32 to vector<16x128xf32>
    %8 = arith.maximumf %6, %7 : vector<16x128xf32>
    %c0_6 = arith.constant 0 : index
    %c0_7 = arith.constant 0 : index
    %9 = vector.load %arg5[%c0_6, %c0_7] : memref<128x512xf32, #tpu.memory_space<vmem>>, vector<128x512xf32>
    %cst_8 = arith.constant dense<0.000000e+00> : vector<16x512xf32>
    %10 = tpu.matmul %8, %9, %cst_8 {dimension_numbers = #tpu.dot_dimension_numbers<[1], [0], [0], [1], [0, 0, 1, 1], [], []>} : vector<16x128xf32>, vector<128x512xf32>, vector<16x512xf32> -> vector<16x512xf32>
    %c0_9 = arith.constant 0 : index
    %c0_10 = arith.constant 0 : index
    %11 = vector.load %arg6[%c0_9, %c0_10] : memref<1x512xf32, #tpu.memory_space<vmem>>, vector<1x512xf32>
    %12 = vector.broadcast %11 : vector<1x512xf32> to vector<16x512xf32>
    %13 = arith.addf %10, %12 : vector<16x512xf32>
    %c0_11 = arith.constant 0 : index
    %c0_12 = arith.constant 0 : index
    %c0_13 = arith.constant 0 : index
    %14 = vector.load %arg7[%c0_11, %c0_12, %c0_13] : memref<1x16x512xf32, #tpu.memory_space<vmem>>, vector<1x16x512xf32>
    %15 = vector.shape_cast %14 : vector<1x16x512xf32> to vector<16x512xf32>
    %16 = vector.shape_cast %13 : vector<16x512xf32> to vector<1x16x512xf32>
    tpu.vector_store %arg7[%c0_11, %c0_12, %c0_13], %16 {strides = array<i32>} : memref<1x16x512xf32, #tpu.memory_space<vmem>>, vector<1x16x512xf32>,
    return
  }
  func.func @transform_0(%arg0: i32, %arg1: i32) -> (i32, i32, i32) {
    %c0_i32 = arith.constant 0 : i32
    %c0_i32_0 = arith.constant 0 : i32
    return %arg0, %arg1, %c0_i32 : i32, i32, i32
  }
  func.func @transform_1(%arg0: i32, %arg1: i32) -> (i32, i32, i32) {
    %c0_i32 = arith.constant 0 : i32
    %c0_i32_0 = arith.constant 0 : i32
    %c0_i32_1 = arith.constant 0 : i32
    return %arg0, %c0_i32, %c0_i32_0 : i32, i32, i32
  }
  func.func @transform_2(%arg0: i32, %arg1: i32) -> (i32, i32) {
    %c0_i32 = arith.constant 0 : i32
    %c0_i32_0 = arith.constant 0 : i32
    %c0_i32_1 = arith.constant 0 : i32
    return %c0_i32, %c0_i32_0 : i32, i32
  }
  func.func @transform_3(%arg0: i32, %arg1: i32) -> (i32, i32) {
    %c0_i32 = arith.constant 0 : i32
    %c0_i32_0 = arith.constant 0 : i32
    %c0_i32_1 = arith.constant 0 : i32
    return %c0_i32, %c0_i32_0 : i32, i32
  }
  func.func @transform_4(%arg0: i32, %arg1: i32) -> (i32, i32) {
    %c0_i32 = arith.constant 0 : i32
    %c0_i32_0 = arith.constant 0 : i32
    %c0_i32_1 = arith.constant 0 : i32
    return %c0_i32, %c0_i32_0 : i32, i32
  }
  func.func @transform_5(%arg0: i32, %arg1: i32) -> (i32, i32, i32) {
    %c0_i32 = arith.constant 0 : i32
    %c0_i32_0 = arith.constant 0 : i32
    return %arg0, %arg1, %c0_i32 : i32, i32, i32
  }
}

</mosaic_0001>

<bundles_post_ra>
// kernel: tpu_custom_call.1
= control target key start
LH: loop header
LB: loop body
LE: loop exit
PB: predicated region body
PF: predicated region fallthrough
CT: control target
= control target key end

     0   :  { %s1758_s0 = inlined_call_operand.hbm [shape: f32[8,16,16], index: 0, kind: input, shape index: {}]   ;;  %s1759_s1 = inlined_call_operand.hbm [shape: f32[8,16,8], index: 1, kind: input, shape index: {}]   ;;  %s1760_s2 = inlined_call_operand.hbm [shape: f32[8,128], index: 2, kind: input, shape index: {}]   ;;  %s1761_s3 = inlined_call_operand.hbm [shape: f32[128,512], index: 3, kind: input, shape index: {}]   ;;  %s1762_s4 = inlined_call_operand.hbm [shape: f32[1,512], index: 4, kind: input, shape index: {}]   ;;  %s1763_s5 = inlined_call_operand.hbm [shape: f32[8,16,512], index: 5, kind: output, shape index: {}]  }
   0x1   :  { %1768 = sst [smem:[#allocation18_spill]] %s1758_s0 }
   0x2   :  { %1769 = sst [smem:[#allocation19_spill]] %s1760_s2 }
   0x3   :  { %1770 = sst [smem:[#allocation20_spill]] %s1761_s3 }
   0x4   :  { %1771 = sst [smem:[#allocation21_spill]] %s1762_s4 }
   0x5   :  { %10 = vsyncpa [#allocation4], 0 }
   0x6   :  { %12 = vsyncpa [#allocation4 + $0x1], 0 }
   0x7   :  { %13 = vsyncpa [#allocation7], 0 }
   0x8   :  { %15 = vsyncpa [#allocation7 + $0x1], 0 }
   0x9   :  { %16 = vsyncpa [#allocation10], 0 }
   0xa   :  { %17 = vsyncpa [#allocation5], 0 }
   0xb   :  { %19 = vsyncpa [#allocation5 + $0x1], 0  ;;  %s1431_s18 = smov 0   ;;  %s1433_s19 = smov 0  }
   0xc   :  { %s1435_s20 = smov 0   ;;  %s1437_s21 = smov 0  }
   0xd   :  { %s1439_s22 = smov 0   ;;  %s1441_s23 = smov 0  }
   0xe LB: > { %s1462_s24 = sadd.s32 4294967295, %s1386_s23   ;;  %s925_s25 = sadd.s32 4294967294, %s1386_s23   ;;  %s1386_s23 = sphi %s1441_s23, %s25_s23   ;;  %s1382_s22 = sphi %s1439_s22, %s1796_s22   ;;  %s1378_s21 = sphi %s1437_s21, %s1795_s21   ;;  %s1374_s20 = sphi %s1435_s20, %s1794_s20   ;;  %s1370_s19 = sphi %s1433_s19, %s1793_s19   ;;  %s1366_s18 = sphi %s1431_s18, %s1792_s18  }
   0xf   : > { %p59_p0 = scmp.ne.s32.totalorder %s1370_s19, %s1366_s18  ;;  %p1764_p1 = scmp.eq.s32.totalorder %s1462_s24, 0 }
  0x10   : > { %p180_p3 = scmp.eq.s32.totalorder %s925_s25, 7  ;;  %p926_p5 = scmp.ge.s32.totalorder %s1386_s23, 1 }
  0x11   : > { %p1471_p4 = por %p1764_p1, %p59_p0  ;;  %p187_p7 = scmp.lt.s32.totalorder %s1386_s23, 9 }
  0x12   : > { %p1476_p6 = por %p180_p3, %p59_p0  ;;  %s1388_s29 = smov [#allocation8]  }
  0x13   : > { %s1772_s26 = scalar_select %p1471_p4, 1, 0 }
  0x14   : > { %s1773_s27 = scalar_select %p1476_p6, 1, 0 }
  0x15   : > { %p1481_p8 = pnand %p926_p5, %p187_p7  ;;  %s200_s30 = sshll.u32 %s1388_s29, 4  ;;  %s201_s30 = int_to_ptr.vmem [resolvable:$true] %s200_s30 }
  0x16   : > { %s1389_s6 = smov [#allocation9]   ;;  %s1390_s9 = smov [#allocation11]  }
  0x17   : > { %s1774_s28 = scalar_select %p1481_p8, 1, 0 }
  0x18   : > { %p1061_p9 = pneg %p1481_p8  ;;  %s210_s7 = sshll.u32 %s1389_s6, 4  ;;  %s1493_s7 = int_to_ptr.vmem [resolvable:$true] %s210_s7 }
  0x19   : > { %s1495_s10 = sshll.u32 %s1390_s9, 4  ;;  %s1776_s2 = sld [smem:[#allocation19_spill]]  ;;  %s225_s10 = int_to_ptr.vmem [resolvable:$true] %s1495_s10 }
  0x1a   : > { %p1489_p10 = pnand %p1061_p9, %p1764_p1 }
  0x1c   : > { %p1505_p12 = pneg %p1489_p10 }
  0x1f   : > { %s1148_s13 = scalar_lea.hbm %s1776_s2, 128 }
  0x20   : > { %p1149_p11 = scmp.ne.s32.totalorder %s1776_s2, %s1148_s13  ;;  %p1155_p3 = scmp.lt.u32.totalorder %s1148_s13, %s1776_s2 }
  0x22   : > { %p1151_p13 = pnand %p1505_p12, %p1149_p11 }
  0x24   : > { %p1152_p0 = pneg %p1151_p13 }
  0x26   : > { %p1157_p5 = pnand %p1155_p3, %p1152_p0 }
  0x28   : > { %1160 = shalt.err (!%p1157_p5)
}
  0x29   : > { %s1161_s29 = scalar_lea.vmem %s201_s30, 128  ;;  %p1169_p2 = scmp.lt.s32.totalorder %s201_s30, %s201_s30 }
  0x2a   : > { %p1162_p7 = scmp.ne.s32.totalorder %s201_s30, %s1161_s29  ;;  %p1170_p6 = scmp.lt.s32.totalorder %s1161_s29, %s1161_s29 }
  0x2c   : > { %p1164_p9 = pnand %p1162_p7, %p1505_p12  ;;  %p1171_p4 = por %p1170_p6, %p1169_p2 }
  0x2e   : > { %p1165_p1 = pneg %p1164_p9 }
  0x30   : > { %p1172_p8 = pnand %p1171_p4, %p1165_p1 }
  0x32   : > { %1175 = shalt.err (!%p1172_p8)
}
  0x33   : > { %1064 = dma.hbm_to_vmem [thread:$0]  (!%p1489_p10), %s1776_s2, 128, %s201_s30, [#allocation7]  }
  0x34   : > { %s1778_s3 = sld [smem:[#allocation20_spill]] }
  0x3a   : > { %s1176_s13 = scalar_lea.hbm %s1778_s3, 8192 }
  0x3b   : > { %p1177_p11 = scmp.ne.s32.totalorder %s1778_s3, %s1176_s13  ;;  %p1183_p1 = scmp.lt.u32.totalorder %s1176_s13, %s1778_s3 }
  0x3d   : > { %p1179_p13 = pnand %p1177_p11, %p1505_p12 }
  0x3f   : > { %p1180_p2 = pneg %p1179_p13 }
  0x41   : > { %p1185_p4 = pnand %p1183_p1, %p1180_p2 }
  0x43   : > { %1188 = shalt.err (!%p1185_p4)
}
  0x44   : > { %s1189_s30 = scalar_lea.vmem %s1493_s7, 8192  ;;  %p1197_p3 = scmp.lt.s32.totalorder %s1493_s7, %s1493_s7 }
  0x45   : > { %p1190_p6 = scmp.ne.s32.totalorder %s1493_s7, %s1189_s30  ;;  %p1198_p5 = scmp.lt.s32.totalorder %s1189_s30, %s1189_s30 }
  0x47   : > { %p1192_p8 = pnand %p1190_p6, %p1505_p12  ;;  %p1199_p7 = por %p1198_p5, %p1197_p3 }
  0x49   : > { %p1193_p0 = pneg %p1192_p8 }
  0x4b   : > { %p1200_p9 = pnand %p1199_p7, %p1193_p0 }
  0x4d   : > { %1203 = shalt.err (!%p1200_p9)
}
  0x4e   : > { %s1391_s29 = smov 512   ;;  %s1392_s6 = smov 32  }
  0x4f   : > { %1067 = dma.hbm_to_vmem [thread:$0]  (!%p1489_p10), %s1778_s3, 8192, %s1493_s7, [#allocation10], %s1391_s29, %s1391_s29, %s1392_s6  }
  0x50   : > { %s1779_s4 = sld [smem:[#allocation21_spill]] }
  0x56   : > { %s1204_s14 = scalar_lea.hbm %s1779_s4, 64 }
  0x57   : > { %p1205_p11 = scmp.ne.s32.totalorder %s1779_s4, %s1204_s14  ;;  %p1211_p1 = scmp.lt.u32.totalorder %s1204_s14, %s1779_s4 }
  0x59   : > { %p1207_p13 = pnand %p1205_p11, %p1505_p12 }
  0x5b   : > { %p1208_p2 = pneg %p1207_p13 }
  0x5d   : > { %p1213_p4 = pnand %p1211_p1, %p1208_p2 }
  0x5f   : > { %1216 = shalt.err (!%p1213_p4)
}
  0x60   : > { %s1217_s9 = scalar_lea.vmem %s225_s10, 64  ;;  %p1225_p3 = scmp.lt.s32.totalorder %s225_s10, %s225_s10 }
  0x61   : > { %p1218_p6 = scmp.ne.s32.totalorder %s225_s10, %s1217_s9  ;;  %p1226_p5 = scmp.lt.s32.totalorder %s1217_s9, %s1217_s9 }
  0x63   : > { %p1220_p8 = pnand %p1218_p6, %p1505_p12  ;;  %p1227_p7 = por %p1226_p5, %p1225_p3 }
  0x65   : > { %p1221_p0 = pneg %p1220_p8 }
  0x67   : > { %p1228_p9 = pnand %p1227_p7, %p1221_p0 }
  0x69   : > { %1231 = shalt.err (!%p1228_p9)
}
  0x6a   : > { %1070 = dma.hbm_to_vmem [thread:$0]  (!%p1489_p10), %s1779_s4, 64, %s225_s10, [#allocation10]  }
  0x6b   : > { %s46_s16 = sadd.s32 1, %s1374_s20  ;;  %s37_s6 = sadd.s32 1, %s1382_s22 }
  0x6c   : > { %p53_p12 = scmp.ne.s32.totalorder %s1374_s20, %s1370_s19  ;;  %p39_p11 = scmp.ge.s32.totalorder %s37_s6, 8 }
  0x6d   : > { %p54_p13 = scmp.eq.s32.totalorder %s1386_s23, 0  ;;  %p1780_p2 = scmp.eq.s32.totalorder %s1462_s24, 7 }
  0x6e   : > { %p1085_p4 = scmp.lt.s32.totalorder %s1386_s23, 8  ;;  %s1798_s6 = smov (%p39_p11, %s37_s6), 0 }
  0x6f   : > { %p1570_p1 = por %p1780_p2, %p53_p12  ;;  %p55_p6 = por %p54_p13, %p53_p12 }
  0x70   : > { %s235_s11 = sand.u32 1, %s1374_s20   ;;  %s41_s12 = ssub.s32 %s1382_s22, %s1798_s6 }
  0x71   : > { %p44_p10 = scmp.eq.s32.totalorder %s41_s12, 0  ;;  %s1580_s10 = sshll.u32 %s235_s11, 4 }
  0x72   : > { %s1767_s13 = sshll.u32 %s1382_s22, 8  ;;  %s1782_s0 = sld [smem:[#allocation18_spill]] }
  0x73   : > { %s1584_s14 = scalar_select %p44_p10, %s1374_s20, %s46_s16  }
  0x74   : > { %s239_s30 = scalar_lea.vmem [#allocation3], %s1580_s10  ;;  %p1598_p8 = pnand %p1085_p4, %p55_p6 }
  0x75   : > { %s248_s9 = sshll.u32 %s239_s30, 4  ;;  %s1602_s29 = scalar_lea.sflag [#allocation4], %s235_s11  ;;  %s1594_s9 = int_to_ptr.vmem [resolvable:$true] %s248_s9 }
  0x76   : > { %p1234_p3 = pneg %p1598_p8 }
  0x78   : > { %s1591_s25 = scalar_lea.hbm %s1782_s0, %s1767_s13  ;;  %s1237_s17 = scalar_lea.hbm %s1782_s0, 2048 }
  0x79   : > { %s1232_s16 = scalar_lea.hbm %s1591_s25, 256  ;;  %p1238_p9 = scmp.lt.u32.totalorder %s1591_s25, %s1782_s0 }
  0x7a   : > { %p1233_p0 = scmp.ne.s32.totalorder %s1591_s25, %s1232_s16  ;;  %p1239_p12 = scmp.lt.u32.totalorder %s1237_s17, %s1232_s16 }
  0x7b   : > { %p1241_p13 = scmp.lt.u32.totalorder %s1232_s16, %s1591_s25 }
  0x7c   : > { %p1235_p5 = pnand %p1234_p3, %p1233_p0  ;;  %p1240_p11 = por %p1239_p12, %p1238_p9 }
  0x7e   : > { %p1236_p7 = pneg %p1235_p5  ;;  %p1242_p2 = por %p1241_p13, %p1240_p11 }
  0x80   : > { %p1243_p4 = pnand %p1242_p2, %p1236_p7 }
  0x82   : > { %1246 = shalt.err (!%p1243_p4)
}
  0x83   : > { %s1247_s11 = scalar_lea.vmem %s1594_s9, 256  ;;  %s1393_s12 = smov [#allocation3]  }
  0x84   : > { %p1248_p6 = scmp.ne.s32.totalorder %s1594_s9, %s1247_s11  ;;  %s1252_s15 = sshll.u32 %s1393_s12, 4  ;;  %s1253_s15 = int_to_ptr.vmem [resolvable:$false] %s1252_s15 }
  0x85   : > { %s1254_s13 = scalar_lea.vmem %s1253_s15, 512  ;;  %p1255_p5 = scmp.lt.s32.totalorder %s1594_s9, %s1253_s15 }
  0x86   : > { %p1250_p10 = pnand %p1248_p6, %p1234_p3  ;;  %p1256_p9 = scmp.lt.s32.totalorder %s1254_s13, %s1247_s11 }
  0x88   : > { %p1251_p0 = pneg %p1250_p10  ;;  %p1257_p12 = por %p1256_p9, %p1255_p5 }
  0x8a   : > { %p1258_p11 = pnand %p1257_p12, %p1251_p0 }
  0x8c   : > { %1261 = shalt.err (!%p1258_p11)
}
  0x8d   : > { %s1394_s16 = smov 128   ;;  %s1395_s17 = smov 8  }
  0x8e   : > { %1074 = dma.hbm_to_vmem [thread:$0]  (!%p1598_p8), %s1591_s25, 256, %s1594_s9, %s1602_s29, %s1394_s16, %s1394_s16, %s1395_s17  }
  0x8f   : > { %s1784_s30 = sshll.u32 %s1382_s22, 8  ;;  %s262_s13 = scalar_lea.vmem [#allocation6], %s1580_s10 }
  0x90   : > { %s1638_s15 = scalar_lea.hbm %s1759_s1, %s1784_s30  ;;  %s269_s0 = sshll.u32 %s262_s13, 4  ;;  %s1641_s0 = int_to_ptr.vmem [resolvable:$true] %s269_s0 }
  0x91   : > { %s258_s2 = sand.u32 1, %s1386_s23   ;;  %s1262_s4 = scalar_lea.hbm %s1638_s15, 256 }
  0x92   : > { %s1644_s3 = scalar_lea.sflag [#allocation7], %s258_s2  ;;  %p1263_p7 = scmp.ne.s32.totalorder %s1638_s15, %s1262_s4 }
  0x93   : > { %s1267_s29 = scalar_lea.hbm %s1759_s1, 2048  ;;  %p1268_p4 = scmp.lt.u32.totalorder %s1638_s15, %s1759_s1 }
  0x94   : > { %p1265_p13 = pnand %p1263_p7, %p1234_p3  ;;  %p1269_p6 = scmp.lt.u32.totalorder %s1267_s29, %s1262_s4 }
  0x95   : > { %p1271_p0 = scmp.lt.u32.totalorder %s1262_s4, %s1638_s15 }
  0x96   : > { %p1266_p2 = pneg %p1265_p13  ;;  %p1270_p10 = por %p1269_p6, %p1268_p4 }
  0x98   : > { %p1272_p5 = por %p1271_p0, %p1270_p10 }
  0x9a   : > { %p1273_p9 = pnand %p1272_p5, %p1266_p2 }
  0x9c   : > { %1276 = shalt.err (!%p1273_p9)
}
  0x9d   : > { %s1277_s2 = scalar_lea.vmem %s1641_s0, 256  ;;  %s1396_s10 = smov [#allocation6]  }
  0x9e   : > { %p1278_p12 = scmp.ne.s32.totalorder %s1641_s0, %s1277_s2  ;;  %s1282_s12 = sshll.u32 %s1396_s10, 4  ;;  %s1283_s12 = int_to_ptr.vmem [resolvable:$false] %s1282_s12 }
  0x9f   : > { %s1284_s13 = scalar_lea.vmem %s1283_s12, 512  ;;  %p1285_p13 = scmp.lt.s32.totalorder %s1641_s0, %s1283_s12 }
  0xa0   : > { %p1280_p11 = pnand %p1278_p12, %p1234_p3  ;;  %p1286_p4 = scmp.lt.s32.totalorder %s1284_s13, %s1277_s2 }
  0xa2   : > { %p1281_p7 = pneg %p1280_p11  ;;  %p1287_p6 = por %p1286_p4, %p1285_p13 }
  0xa4   : > { %p1288_p10 = pnand %p1287_p6, %p1281_p7 }
  0xa6   : > { %1291 = shalt.err (!%p1288_p10)
}
  0xa7   : > { %1077 = dma.hbm_to_vmem [thread:$0]  (!%p1598_p8), %s1638_s15, 256, %s1641_s0, %s1644_s3, %s1394_s16, %s1394_s16, %s1395_s17  }
  0xa8   : > { %p1785_p3 = scmp.ne.s32.totalorder %s1774_s28, 0 }
  0xa9   : > { %s1676_s4 = sand.u32 (!%p1785_p3), 1, %s1370_s19   ;;  %p1786_p2 = scmp.ne.s32.totalorder (!%p1785_p3), %s1772_s26, 0 }
  0xaa   : > { %281 = sbr.rel (%p1785_p3) target bundleno = 859 (0x35b), region = 40  ;;  %s938_s25 = sshll.u32 (!%p1785_p3), %s1676_s4, 4 }
  0xab   : > { %s284_s9 = scalar_lea.sflag (!%p1785_p3), [#allocation4], %s1676_s4  ;;  %s1680_s29 = scalar_lea.vmem (!%p1785_p3), [#allocation3], %s938_s25 }
  0xb1   : > { %1345 = dma.done.wait (%p1786_p2), %s284_s9, 256  }
  0xb2   : > { %1347 = vsyncadd (%p1786_p2), %s284_s9, 4294967040  ;;  %s292_s0 = sand.u32 1, %s1462_s24   ;;  %s296_s28 = scalar_lea.vmem [#allocation6], %s938_s25 }
  0xb3   : > { %s293_s3 = scalar_lea.sflag [#allocation7], %s292_s0 }
  0xb4   : > { %1349 = dma.done.wait (%p1786_p2), %s293_s3, 256  }
  0xb5   : > { %1351 = vsyncadd (%p1786_p2), %s293_s3, 4294967040  ;;  %p1787_p8 = scmp.eq.s32.totalorder %s1462_s24, 0 }
  0xb7   : > { %1353 = dma.done.wait (%p1787_p8), [#allocation7], 128   ;;  %p1788_p0 = pmov %p1787_p8 }
  0xb9   : > { %1355 = vsyncadd (%p1788_p0), [#allocation7], 4294967168  ;;  %p1789_p5 = pmov %p1788_p0 }
  0xba   : > { %p1790_p9 = pmov %p1788_p0 }
  0xbb   : > { %1357 = dma.done.wait (%p1789_p5), [#allocation10], 8256  }
  0xbc   : > { %1359 = vsyncadd (%p1790_p9), [#allocation10], 4294959040  ;;  %vm349_vm0 = vcmask 64512   ;;  %v348_v0 = vld [vmem:[#allocation8] sm:$0xff]  ;;  %v347_v2 = vld [vmem:[%s296_s28 + $0x8] sm:$0xff]  ;;  %vm437_vm1 = vcmask 130048  }
  0xbd   : > { %v346_v1 = vld [vmem:[%s296_s28] sm:$0xff]  ;;  %963 = vmatprep.subr.mxu0 %v348_v0  ;;  %v521_v7 = vld [vmem:[#allocation9] sm:$0xff]  ;;  %v523_v52 = vld [vmem:[#allocation9 + $0x10] sm:$0xff]  ;;  %s943_s24 = sshll.u32 %s1676_s4, 6  ;;  %s955_s16 = sshll.u32 %s1378_s21, 10 }
  0xbe   : > { %965 = vmatprep.mubr.msk.f32.mxu0 %vm349_vm0, %v346_v1  ;;  %964 = vmatpush3.msra.mxu0 %v348_v0  ;;  %v433_v3 = vld [vmem:[%s1680_s29] sm:$0xff]  ;;  %v525_v8 = vld [vmem:[#allocation9 + $0x20] sm:$0xff]  ;;  %v527_v53 = vld [vmem:[#allocation9 + $0x30] sm:$0xff]  ;;  %s339_s26 = scalar_lea.vmem [#allocation12], %s943_s24  ;;  %s1710_s21 = scalar_lea.hbm %s1763_s5, %s955_s16 }
  0xbf   : > { %966 = vmatmul.mubr.msk.f32.vlgmr.msra.gmra.mrb[0].mxu0 %vm349_vm0, %v347_v2  ;;  %972 = vmatprep.mubr.msk.f32.mxu1 %vm437_vm1, %v433_v3  ;;  %v522_v4 = vld [vmem:[#allocation9 + $0x8] sm:$0xff]  ;;  %v981_v9 = vpack.c.bf16 %v525_v8, %v521_v7  ;;  %v529_v13 = vld [vmem:[#allocation9 + $0x40] sm:$0xff]  ;;  %v524_v46 = vld [vmem:[#allocation9 + $0x18] sm:$0xff]  ;;  %v1013_v57 = vpack.c.bf16 %v527_v53, %v523_v52  ;;  %s786_s7 = sshll.u32 %s339_s26, 4  ;;  %s770_s30 = scalar_lea.sflag [#allocation5], %s1676_s4  ;;  %s1705_s7 = int_to_ptr.vmem [resolvable:$true] %s786_s7 }
  0xc0   : > { %v526_v5 = vld [vmem:[#allocation9 + $0x28] sm:$0xff]  ;;  %v533_v14 = vld [vmem:[#allocation9 + $0x60] sm:$0xff]  ;;  %v528_v47 = vld [vmem:[#allocation9 + $0x38] sm:$0xff]  ;;  %s1292_s11 = scalar_lea.vmem %s1705_s7, 1024  ;;  %s1398_s2 = smov [#allocation12]  }
  0xc1   : > { %v979_v6 = vpack.c.bf16 %v526_v5, %v522_v4  ;;  %v530_v10 = vld [vmem:[#allocation9 + $0x48] sm:$0xff]  ;;  %v985_v15 = vpack.c.bf16 %v533_v14, %v529_v13  ;;  %v537_v19 = vld [vmem:[#allocation9 + $0x80] sm:$0xff]  ;;  %v1011_v51 = vpack.c.bf16 %v528_v47, %v524_v46  ;;  %v532_v54 = vld [vmem:[#allocation9 + $0x58] sm:$0xff]  ;;  %p1293_p12 = scmp.ne.s32.totalorder %s1705_s7, %s1292_s11  ;;  %s1296_s10 = sshll.u32 %s1398_s2, 4  ;;  %s1297_s10 = int_to_ptr.vmem [resolvable:$false] %s1296_s10 }
  0xc2   : > { %v534_v11 = vld [vmem:[#allocation9 + $0x68] sm:$0xff]  ;;  %v541_v20 = vld [vmem:[#allocation9 + $0xa0] sm:$0xff]  ;;  %v536_v55 = vld [vmem:[#allocation9 + $0x78] sm:$0xff]  ;;  %s1298_s12 = scalar_lea.vmem %s1297_s10, 2048  ;;  %p1299_p13 = scmp.lt.s32.totalorder %s1705_s7, %s1297_s10 }
  0xc3   : > { %980 = vmatprep.subr.bf16.mxu0 %v979_v6  ;;  %v983_v12 = vpack.c.bf16 %v534_v11, %v530_v10  ;;  %v538_v16 = vld [vmem:[#allocation9 + $0x88] sm:$0xff]  ;;  %v989_v21 = vpack.c.bf16 %v541_v20, %v537_v19  ;;  %v545_v25 = vld [vmem:[#allocation9 + $0xc0] sm:$0xff]  ;;  %v1015_v58 = vpack.c.bf16 %v536_v55, %v532_v54  ;;  %v531_v59 = vld [vmem:[#allocation9 + $0x50] sm:$0xff]  ;;  %p1294_p11 = pnand %p1293_p12, %p1570_p1  ;;  %p1300_p4 = scmp.lt.s32.totalorder %s1298_s12, %s1292_s11 }
  0xc4   : > { %982 = vmatpush1.bf16.msra.mxu0 %v981_v9  ;;  %v542_v17 = vld [vmem:[#allocation9 + $0xa8] sm:$0xff]  ;;  %v549_v26 = vld [vmem:[#allocation9 + $0xe0] sm:$0xff]  ;;  %v535_v60 = vld [vmem:[#allocation9 + $0x70] sm:$0xff] }
  0xc5   : > { %984 = vmatprep.subr.bf16.mxu0 %v983_v12  ;;  %v987_v18 = vpack.c.bf16 %v542_v17, %v538_v16  ;;  %v546_v22 = vld [vmem:[#allocation9 + $0xc8] sm:$0xff]  ;;  %v993_v27 = vpack.c.bf16 %v549_v26, %v545_v25  ;;  %v553_v31 = vld [vmem:[#allocation9 + $0x100] sm:$0xff]  ;;  %v540_v61 = vld [vmem:[#allocation9 + $0x98] sm:$0xff]  ;;  %v1017_v63 = vpack.c.bf16 %v535_v60, %v531_v59  ;;  %p1295_p7 = pneg %p1294_p11  ;;  %p1301_p6 = por %p1300_p4, %p1299_p13 }
  0xc6   : > { %v550_v23 = vld [vmem:[#allocation9 + $0xe8] sm:$0xff]  ;;  %v557_v32 = vld [vmem:[#allocation9 + $0x120] sm:$0xff]  ;;  %v544_v62 = vld [vmem:[#allocation9 + $0xb8] sm:$0xff] }
  0xc7   : > { %v991_v24 = vpack.c.bf16 %v550_v23, %v546_v22  ;;  %v554_v28 = vld [vmem:[#allocation9 + $0x108] sm:$0xff]  ;;  %v997_v33 = vpack.c.bf16 %v557_v32, %v553_v31  ;;  %v561_v37 = vld [vmem:[#allocation9 + $0x140] sm:$0xff]  ;;  %v1019_v0 = vpack.c.bf16 %v544_v62, %v540_v61  ;;  %v539_v1 = vld [vmem:[#allocation9 + $0x90] sm:$0xff]  ;;  %p1302_p10 = pnand %p1301_p6, %p1295_p7 }
  0xc8   : > { %986 = vmatpush1.bf16.msra.mxu0 %v985_v15  ;;  %v558_v29 = vld [vmem:[#allocation9 + $0x128] sm:$0xff]  ;;  %v565_v38 = vld [vmem:[#allocation9 + $0x160] sm:$0xff]  ;;  %v543_v2 = vld [vmem:[#allocation9 + $0xb0] sm:$0xff] }
  0xc9   : > { %988 = vmatprep.subr.bf16.mxu0 %v987_v18  ;;  %v995_v30 = vpack.c.bf16 %v558_v29, %v554_v28  ;;  %v562_v34 = vld [vmem:[#allocation9 + $0x148] sm:$0xff]  ;;  %v1001_v39 = vpack.c.bf16 %v565_v38, %v561_v37  ;;  %v569_v43 = vld [vmem:[#allocation9 + $0x180] sm:$0xff]  ;;  %v548_v3 = vld [vmem:[#allocation9 + $0xd8] sm:$0xff]  ;;  %v1021_v5 = vpack.c.bf16 %v543_v2, %v539_v1 }
  0xca   : > { %v566_v35 = vld [vmem:[#allocation9 + $0x168] sm:$0xff]  ;;  %v573_v44 = vld [vmem:[#allocation9 + $0x1a0] sm:$0xff]  ;;  %v552_v4 = vld [vmem:[#allocation9 + $0xf8] sm:$0xff] }
  0xcb   : > { %v999_v36 = vpack.c.bf16 %v566_v35, %v562_v34  ;;  %v570_v40 = vld [vmem:[#allocation9 + $0x188] sm:$0xff]  ;;  %v1005_v45 = vpack.c.bf16 %v573_v44, %v569_v43  ;;  %v434_v56 = vld [vmem:[%s1680_s29 + $0x8] sm:$0xff]  ;;  %v1023_v6 = vpack.c.bf16 %v552_v4, %v548_v3  ;;  %v556_v9 = vld [vmem:[#allocation9 + $0x118] sm:$0xff] }
  0xcc   : > { %990 = vmatpush1.bf16.msra.mxu0 %v989_v21  ;;  %v574_v41 = vld [vmem:[#allocation9 + $0x1a8] sm:$0xff]  ;;  %v547_v7 = vld [vmem:[#allocation9 + $0xd0] sm:$0xff]  ;;  %v560_v10 = vld [vmem:[#allocation9 + $0x138] sm:$0xff] }
  0xcd   : > { %992 = vmatprep.subr.bf16.mxu0 %v991_v24  ;;  %v1003_v42 = vpack.c.bf16 %v574_v41, %v570_v40  ;;  %v551_v8 = vld [vmem:[#allocation9 + $0xf0] sm:$0xff]  ;;  %v1027_v12 = vpack.c.bf16 %v560_v10, %v556_v9  ;;  %v564_v15 = vld [vmem:[#allocation9 + $0x158] sm:$0xff]  ;;  %v578_v28 = vld [vmem:[#allocation9 + $0x1c8] sm:$0xff]  ;;  %v1397_v40 = vmov 0.0  }
  0xce   : > { %v1025_v11 = vpack.c.bf16 %v551_v8, %v547_v7  ;;  %v555_v13 = vld [vmem:[#allocation9 + $0x110] sm:$0xff]  ;;  %v568_v16 = vld [vmem:[#allocation9 + $0x178] sm:$0xff]  ;;  %v582_v29 = vld [vmem:[#allocation9 + $0x1e8] sm:$0xff]  ;;  %671 = vmatprep.mubr.f32.mxu0 %v1397_v40 }
  0xcf   : > { %v559_v14 = vld [vmem:[#allocation9 + $0x130] sm:$0xff]  ;;  %v1031_v18 = vpack.c.bf16 %v568_v16, %v564_v15  ;;  %v572_v21 = vld [vmem:[#allocation9 + $0x198] sm:$0xff]  ;;  %v1007_v31 = vpack.c.bf16 %v582_v29, %v578_v28  ;;  %v581_v34 = vld [vmem:[#allocation9 + $0x1e0] sm:$0xff] }
  0xd0   : > { %994 = vmatpush1.bf16.msra.mxu0 %v993_v27  ;;  %v1029_v17 = vpack.c.bf16 %v559_v14, %v555_v13  ;;  %v563_v19 = vld [vmem:[#allocation9 + $0x150] sm:$0xff]  ;;  %v576_v22 = vld [vmem:[#allocation9 + $0x1b8] sm:$0xff] }
  0xd1   : > { %996 = vmatprep.subr.bf16.mxu0 %v995_v30  ;;  %v567_v20 = vld [vmem:[#allocation9 + $0x170] sm:$0xff]  ;;  %v1035_v24 = vpack.c.bf16 %v576_v22, %v572_v21  ;;  %v580_v30 = vld [vmem:[#allocation9 + $0x1d8] sm:$0xff] }
  0xd2   : > { %v1033_v23 = vpack.c.bf16 %v567_v20, %v563_v19  ;;  %v571_v25 = vld [vmem:[#allocation9 + $0x190] sm:$0xff]  ;;  %v584_v32 = vld [vmem:[#allocation9 + $0x1f8] sm:$0xff] }
  0xd3   : > { %v575_v26 = vld [vmem:[#allocation9 + $0x1b0] sm:$0xff]  ;;  %v1039_v35 = vpack.c.bf16 %v584_v32, %v580_v30 }
  0xd4   : > { %998 = vmatpush1.bf16.msra.mxu0 %v997_v33  ;;  %v1037_v27 = vpack.c.bf16 %v575_v26, %v571_v25  ;;  %v577_v33 = vld [vmem:[#allocation9 + $0x1c0] sm:$0xff]  ;;  %v579_v37 = vld [vmem:[#allocation9 + $0x1d0] sm:$0xff] }
  0xd5   : > { %1000 = vmatprep.subr.bf16.mxu0 %v999_v36  ;;  %v1009_v36 = vpack.c.bf16 %v581_v34, %v577_v33  ;;  %v583_v38 = vld [vmem:[#allocation9 + $0x1f0] sm:$0xff] }
  0xd8   : > { %1002 = vmatpush1.bf16.msra.mxu0 %v1001_v39  ;;  %v1041_v39 = vpack.c.bf16 %v583_v38, %v579_v37 }
  0xd9   : > { %1004 = vmatprep.subr.bf16.mxu0 %v1003_v42 }
  0xdc   : > { %1006 = vmatpush1.bf16.msra.mxu0 %v1005_v45  ;;  %v587_v45 = vlaneseq }
  0xdd   : > { %1008 = vmatprep.subr.bf16.mxu0 %v1007_v31 }
  0xde   : > { %v588_v46 = vshrl.u32 %v587_v45, 7 }
  0xe0   : > { %1010 = vmatpush1.bf16.msra.mxu0 %v1009_v36  ;;  %v589_v47 = vsub.s32 0, %v588_v46 }
 0x192   : > { %v967_v48 = vpop.f32.mrb[0].mxu0 }
 0x193   : > { %v422_v49 = vpop.f32.mrb[1].mxu0 }
 0x194   : > { %v975_v50 = vpack.c.bf16 %v967_v48, %v422_v49  ;;  %v597_v48 = vsub.s32 2, %v588_v46  ;;  %v585_v49 = vld [vmem:[#allocation11] sm:$0xf] }
 0x195   : > { %v590_v52 = vrot.slane %v585_v49, %v589_v47 }
 0x196   : > { %976 = vmatprep.subr.bf16.mxu1 %v975_v50  ;;  %v598_v53 = vrot.slane %v585_v49, %v597_v48 }
 0x197   : > { %978 = vmatpush3.bf16.msra.mxu1 %v975_v50  ;;  %v593_v50 = vsub.s32 1, %v588_v46 }
 0x198   : > { %1012 = vmatprep.subr.bf16.mxu1 %v1011_v51  ;;  %v601_v51 = vsub.s32 3, %v588_v46 }
 0x199   : > { %v594_v54 = vrot.slane %v585_v49, %v593_v50 }
 0x19a   : > { %973 = vmatmul.mubr.msk.f32.vlgmr.msra.gmra.mrb[0].mxu1 %vm437_vm1, %v434_v56  ;;  %v602_v55 = vrot.slane %v585_v49, %v601_v51 }
 0x19b   : > { %1014 = vmatpush1.bf16.msra.mxu1 %v1013_v57  ;;  %748 = vmatprep.mubr.f32.mxu1 %v1397_v40 }
 0x19c   : > { %1016 = vmatprep.subr.bf16.mxu1 %v1015_v58 }
 0x19f   : > { %1018 = vmatpush1.bf16.msra.mxu1 %v1017_v63 }
 0x1a0   : > { %1020 = vmatprep.subr.bf16.mxu1 %v1019_v0 }
 0x1a3   : > { %1022 = vmatpush1.bf16.msra.mxu1 %v1021_v5 }
 0x1a4   : > { %1024 = vmatprep.subr.bf16.mxu1 %v1023_v6 }
 0x1a7   : > { %1026 = vmatpush1.bf16.msra.mxu1 %v1025_v11 }
 0x1a8   : > { %1028 = vmatprep.subr.bf16.mxu1 %v1027_v12 }
 0x1ab   : > { %1030 = vmatpush1.bf16.msra.mxu1 %v1029_v17 }
 0x1ac   : > { %1032 = vmatprep.subr.bf16.mxu1 %v1031_v18 }
 0x1af   : > { %1034 = vmatpush1.bf16.msra.mxu1 %v1033_v23 }
 0x1b0   : > { %1036 = vmatprep.subr.bf16.mxu1 %v1035_v24 }
 0x1b3   : > { %1038 = vmatpush1.bf16.msra.mxu1 %v1037_v27 }
 0x1b4   : > { %1040 = vmatprep.subr.bf16.mxu1 %v1039_v35 }
 0x1b7   : > { %1042 = vmatpush1.bf16.msra.mxu1 %v1041_v39 }
 0x26d   : > { %v974_v41 = vpop.f32.mrb[0].mxu1 }
 0x26e   : > { %v510_v42 = vpop.f32.mrb[1].mxu1  ;;  %v520_v44 = vmax.f32 %v974_v41, 0.0 }
 0x26f   : > { %v519_v43 = vmax.f32 %v510_v42, 0.0 }
 0x271   : > { %672 = vmatmul.mubr.f32.vlgmr.msra.gmra.mrb[2].mxu0 %v519_v43  ;;  %749 = vmatmul.mubr.f32.vlgmr.msra.gmra.mrb[2].mxu1 %v519_v43 }
 0x272   : > { %677 = vmatprep.mubr.f32.mxu0 %v1397_v40  ;;  %754 = vmatprep.mubr.f32.mxu1 %v1397_v40 }
 0x275   : > { %678 = vmatmul.mubr.f32.gmra.mrb[4].mxu0 %v520_v44  ;;  %755 = vmatmul.mubr.f32.gmra.mrb[4].mxu1 %v520_v44 }
 0x344   : > { %v673_v56 = vpop.f32.mrb[2].mxu0  ;;  %v750_v57 = vpop.f32.mrb[2].mxu1 }
 0x345   : > { %v674_v58 = vadd.f32 %v673_v56, %v590_v52  ;;  %v751_v59 = vadd.f32 %v750_v57, %v598_v53  ;;  %v675_v60 = vpop.f32.mrb[3].mxu0  ;;  %v752_v61 = vpop.f32.mrb[3].mxu1 }
 0x346   : > { %v676_v62 = vadd.f32 %v675_v60, %v594_v54  ;;  %v753_v63 = vadd.f32 %v752_v61, %v602_v55 }
 0x347   : > { %761 = vst [vmem:[%s339_s26] sm:$0xff] %v674_v58  ;;  %763 = vst [vmem:[%s339_s26 + $0x10] sm:$0xff] %v751_v59 }
 0x348   : > { %762 = vst [vmem:[%s339_s26 + $0x8] sm:$0xff] %v676_v62  ;;  %764 = vst [vmem:[%s339_s26 + $0x18] sm:$0xff] %v753_v63  ;;  %v679_v0 = vpop.f32.mrb[4].mxu0  ;;  %v756_v1 = vpop.f32.mrb[4].mxu1 }
 0x349   : > { %v680_v2 = vadd.f32 %v679_v0, %v590_v52  ;;  %v757_v3 = vadd.f32 %v756_v1, %v598_v53  ;;  %v681_v4 = vpop.f32.mrb[5].mxu0  ;;  %v758_v5 = vpop.f32.mrb[5].mxu1 }
 0x34a   : > { %v682_v6 = vadd.f32 %v681_v4, %v594_v54  ;;  %v759_v7 = vadd.f32 %v758_v5, %v602_v55 }
 0x34b   : > { %765 = vst [vmem:[%s339_s26 + $0x20] sm:$0xff] %v680_v2  ;;  %767 = vst [vmem:[%s339_s26 + $0x30] sm:$0xff] %v757_v3 }
 0x34c   : > { %766 = vst [vmem:[%s339_s26 + $0x28] sm:$0xff] %v682_v6  ;;  %768 = vst [vmem:[%s339_s26 + $0x38] sm:$0xff] %v759_v7 }
 0x34d   : > { %1305 = shalt.err (!%p1302_p10)
}
 0x34e   : > { %s1306_s13 = scalar_lea.hbm %s1710_s21, 1024  ;;  %s1310_s29 = scalar_lea.hbm %s1763_s5, 8192 }
 0x34f   : > { %p1307_p3 = scmp.ne.s32.totalorder %s1710_s21, %s1306_s13  ;;  %p1311_p0 = scmp.lt.u32.totalorder %s1710_s21, %s1763_s5 }
 0x350   : > { %p1312_p5 = scmp.lt.u32.totalorder %s1310_s29, %s1306_s13  ;;  %p1314_p12 = scmp.lt.u32.totalorder %s1306_s13, %s1710_s21 }
 0x351   : > { %p1308_p2 = pnand %p1307_p3, %p1570_p1 }
 0x352   : > { %p1313_p9 = por %p1312_p5, %p1311_p0 }
 0x353   : > { %p1309_p8 = pneg %p1308_p2 }
 0x354   : > { %p1315_p11 = por %p1314_p12, %p1313_p9 }
 0x356   : > { %p1316_p7 = pnand %p1315_p11, %p1309_p8 }
 0x358   : > { %1319 = shalt.err (!%p1316_p7)
}
 0x359   : > { %s1399_s28 = smov 512   ;;  %s1400_s24 = smov 32  }
 0x35a   : > { %1059 = dma.vmem_to_hbm [thread:$0]  (%p1570_p1), %s1705_s7, 1024, %s1710_s21, %s770_s30, %s1399_s28, %s1399_s28, %s1400_s24  }
 0x35b PF: > { %p1089_p13 = scmp.ge.s32.totalorder %s1386_s23, 2  ;;  %s801_s26 = sand.u32 1, %s1366_s18  }
 0x35c   : > { %p1791_p4 = scmp.ne.s32.totalorder %s1773_s27, 0  ;;  %s802_s16 = scalar_lea.sflag [#allocation5], %s801_s26 }
 0x35e   : > { %p1079_p6 = pnand %p1089_p13, %p1791_p4 }
 0x360   : > { %1361 = dma.done.wait (!%p1079_p6), %s802_s16, 1024  }
 0x361   : > { %1363 = vsyncadd (!%p1079_p6), %s802_s16, 4294966272  ;;  %s25_s23 = sadd.s32 1, %s1386_s23   ;;  %s1792_s18 = smov %s1370_s19 }
 0x362   : > { %p22_p10 = scmp.ge.s32.totalorder %s25_s23, 10   ;;  %s1793_s19 = smov %s1374_s20 }
 0x363   : > { %s1794_s20 = smov %s1584_s14  ;;  %s1795_s21 = smov %s1382_s22 }
 0x364   : > { %s1796_s22 = smov %s1798_s6  ;;  %24 = sbr.rel (!%p22_p10) target bundleno = 14 (0xe), region = 114 }
 0x36b   :  { %807 = vsyncpa [#allocation4], 1 }
 0x36c   :  { %809 = vsyncpa [#allocation4 + $0x1], 1 }
 0x36d   :  { %810 = vsyncpa [#allocation7], 1 }
 0x36e   :  { %812 = vsyncpa [#allocation7 + $0x1], 1 }
 0x36f   :  { %813 = vsyncpa [#allocation10], 1 }
 0x370   :  { %814 = vsyncpa [#allocation5], 1 }
 0x371   :  { %816 = vsyncpa [#allocation5 + $0x1], 1 }

</bundles_post_ra>
